<compile_context>
chip_gen: v6e
topology: v6e:2x2x1
jax: 0.10.0
libtpu: 0.0.40
codegen_flags: <defaults>
</compile_context>

<pallas_src>
import functools

import jax
import jax.numpy as jnp
from jax.experimental import pallas as pl
from jax.experimental.pallas import tpu as pltpu


def _round_up(n, m):
    return ((n + m - 1) // m) * m


def _supports_bf16_vpu():
    """True on chips with a native bf16 VPU (v6e/v7x); False on v5e and older."""
    try:
        kind = jax.devices()[0].device_kind.lower()
    except Exception:  # pragma: no cover - be conservative if we can't tell
        return False
    for tag in ("v2", "v3", "v4", "v5"):
        if tag in kind:
            return False
    return True


def dqn_kernel(x_ref, w1_ref, b1_ref, w2_ref, b2_ref, w3_ref, b3_ref, o_ref,
               h1_ref, h2_ref, *, bf16_elementwise):
    bf16 = jnp.bfloat16
    # x arrives as raw f32 (tb, state_dim); cast to bf16 on the VPU (no wrapper-side pass).
    x = x_ref[...].astype(bf16)

    # Layer 1: bf16 MXU matmul, f32 accumulation.
    acc1 = jnp.dot(x, w1_ref[...], preferred_element_type=jnp.float32)
    if bf16_elementwise:   # v6e/v7x: native bf16 VPU -> half the elementwise vreg traffic
        h1_ref[...] = jnp.maximum(acc1.astype(bf16) + b1_ref[...].astype(bf16), 0.0)
    else:                  # v5e: keep elementwise in f32 (no bf16 VALU), cast at the store
        h1_ref[...] = jnp.maximum(acc1 + b1_ref[...], 0.0).astype(bf16)

    # Layer 2: feed the MXU from the bf16 scratch (no f32 VMEM round-trip).
    acc2 = jnp.dot(h1_ref[...], w2_ref[...], preferred_element_type=jnp.float32)
    if bf16_elementwise:
        h2_ref[...] = jnp.maximum(acc2.astype(bf16) + b2_ref[...].astype(bf16), 0.0)
    else:
        h2_ref[...] = jnp.maximum(acc2 + b2_ref[...], 0.0).astype(bf16)

    # Layer 3: Q-values, lane-padded to 128 output columns (unmasked vst). Padded
    # weight/bias columns are zero, so padded output lanes are exactly 0.
    acc3 = jnp.dot(h2_ref[...], w3_ref[...], preferred_element_type=jnp.float32)
    o_ref[...] = (acc3 + b3_ref[...]).astype(o_ref.dtype)


class DQNetworkPallas:
    """Fused Pallas forward for DQNetwork. Params padded/cast once at construction."""

    def __init__(self, params, *, block_b=2048):
        w1, b1, w2, b2, w3, b3 = (params[k] for k in ("w1", "b1", "w2", "b2", "w3", "b3"))
        self.state_dim, self.hidden = w1.shape
        self.action_dim = w3.shape[1]
        self.act_pad = _round_up(self.action_dim, 128)
        self.block_b = int(block_b)
        self.bf16_elementwise = _supports_bf16_vpu()

        bf16, f32 = jnp.bfloat16, jnp.float32
        # One-time pad/cast (hoisted out of the per-call path). w1 stays unpadded:
        # the MXU handles K=state_dim directly and x keeps its raw f32 HBM footprint.
        self.w1 = jnp.asarray(w1, bf16)
        self.w2 = jnp.asarray(w2, bf16)
        self.w3 = jnp.zeros((self.hidden, self.act_pad), bf16).at[:, :self.action_dim].set(
            jnp.asarray(w3, bf16))
        self.b1 = jnp.asarray(b1, f32).reshape(1, self.hidden)
        self.b2 = jnp.asarray(b2, f32).reshape(1, self.hidden)
        self.b3 = jnp.zeros((1, self.act_pad), f32).at[:, :self.action_dim].set(
            jnp.asarray(b3, f32).reshape(1, self.action_dim))
        # TODO(synk): pack w1|b1|w2|b2|w3|b3 into one contiguous HBM buffer so the six
        # parameter DMAs collapse into one for the latency-bound single-step path, and
        # single-buffer the resident weight BlockSpecs once pipeline_mode=Buffered(1)
        # is verified on the target jax version.

    def __call__(self, x, *, slice_output=True):
        if x.dtype != jnp.float32:
            x = x.astype(jnp.float32)
        B = x.shape[0]
        hidden, act_pad, state_dim = self.hidden, self.act_pad, self.state_dim

        # Batch tile: large (amortize per-step overhead), multiple of 16 (bf16 sublane
        # packing), capped at ~half the batch (>=256) so v7x still gets >=2 grid steps.
        b16 = _round_up(B, 16)
        half = max(_round_up((b16 + 1) // 2, 16), 256)
        tb = max(min(self.block_b, b16, half), 16)
        grid = (pl.cdiv(B, tb),)

        flops = 2 * B * (state_dim * hidden + hidden * hidden + hidden * act_pad)
        bytes_accessed = int(
            x.size * 4
            + sum(int(a.size) * a.dtype.itemsize
                  for a in (self.w1, self.w2, self.w3, self.b1, self.b2, self.b3))
            + B * act_pad * 4)

        # Weights/biases: full block, constant index_map -> VMEM-resident across steps.
        def resident(a):
            return pl.BlockSpec(a.shape, lambda i: (0,) * a.ndim)

        kernel = functools.partial(dqn_kernel, bf16_elementwise=self.bf16_elementwise)

        out = pl.pallas_call(
            kernel,
            out_shape=jax.ShapeDtypeStruct((B, act_pad), jnp.float32),
            grid=grid,
            in_specs=[
                pl.BlockSpec((tb, state_dim), lambda i: (i, 0)),   # raw f32 x, batch-tiled
                resident(self.w1), resident(self.b1),
                resident(self.w2), resident(self.b2),
                resident(self.w3), resident(self.b3),
            ],
            out_specs=pl.BlockSpec((tb, act_pad), lambda i: (i, 0)),
            scratch_shapes=[
                pltpu.VMEM((tb, hidden), jnp.bfloat16),   # h1 (bf16, halves vst traffic)
                pltpu.VMEM((tb, hidden), jnp.bfloat16),   # h2
            ],
            compiler_params=pltpu.CompilerParams(
                dimension_semantics=("parallel",),
                vmem_limit_bytes=32 * 1024 * 1024),
            cost_estimate=pl.CostEstimate(
                flops=flops, transcendentals=0, bytes_accessed=bytes_accessed),
        )(x, self.w1, self.b1, self.w2, self.b2, self.w3, self.b3)

        if slice_output:
            return out[:, :self.action_dim]
        # Padded lanes [action_dim:act_pad) are exactly 0; callers on the hot path
        # should mask them (e.g. set -inf before argmax) instead of slicing.
        return out


def init_params(key, state_dim, action_dim, hidden=256):
    """Deterministic init matching PyTorch nn.Linear default (uniform +/- 1/sqrt(fan_in))."""
    ks = jax.random.split(key, 6)

    def linear(kw, kb, fan_in, fan_out):
        bound = 1.0 / jnp.sqrt(fan_in)
        w = jax.random.uniform(kw, (fan_in, fan_out), jnp.float32, -bound, bound)
        b = jax.random.uniform(kb, (fan_out,), jnp.float32, -bound, bound)
        return w, b

    w1, b1 = linear(ks[0], ks[1], state_dim, hidden)
    w2, b2 = linear(ks[2], ks[3], hidden, hidden)
    w3, b3 = linear(ks[4], ks[5], hidden, action_dim)
    return dict(w1=w1, b1=b1, w2=w2, b2=b2, w3=w3, b3=b3)


def dq_network_ref(x, p, *, bf16_elementwise):
    """Pure-JAX reference mirroring the kernel's bf16-operand / f32-accumulate arithmetic."""
    bf, f32 = jnp.bfloat16, jnp.float32

    def layer(h, w, b, relu):
        acc = jnp.dot(h.astype(bf), w.astype(bf), preferred_element_type=f32)
        if not relu:
            return acc + b.astype(f32)
        if bf16_elementwise:
            return jnp.maximum(acc.astype(bf) + b.astype(bf), 0.0)
        return jnp.maximum(acc + b.astype(f32), 0.0).astype(bf)

    h1 = layer(x.astype(f32), p["w1"], p["b1"], True)
    h2 = layer(h1, p["w2"], p["b2"], True)
    return layer(h2, p["w3"], p["b3"], False)


if __name__ == "__main__":
    state_dim, action_dim, batch = 32, 8, 8
    key = jax.random.PRNGKey(0)
    k_params, k_x, k_x2 = jax.random.split(key, 3)

    params = init_params(k_params, state_dim, action_dim)
    net = DQNetworkPallas(params)

    # Small single-tile case (grid of 1, batch smaller than the tile).
    x = jax.random.normal(k_x, (batch, state_dim), jnp.float32)
    out = jax.block_until_ready(net(x))
    ref = dq_network_ref(x, params, bf16_elementwise=net.bf16_elementwise)
    assert out.shape == (batch, action_dim)
    assert jnp.allclose(out, ref, atol=2e-3, rtol=2e-3), "mismatch vs JAX reference (small)"

    # Multi-step grid case with a partial last tile (exercises the pipelined batch tiling).
    x2 = jax.random.normal(k_x2, (1000, state_dim), jnp.float32)
    out2 = jax.block_until_ready(net(x2))
    ref2 = dq_network_ref(x2, params, bf16_elementwise=net.bf16_elementwise)
    assert out2.shape == (1000, action_dim)
    assert jnp.allclose(out2, ref2, atol=2e-3, rtol=2e-3), "mismatch vs JAX reference (grid)"

    # Padded-output path (no wrapper slice): extra lanes must be exactly zero.
    out_pad = jax.block_until_ready(net(x2, slice_output=False))
    assert out_pad.shape == (1000, net.act_pad)
    assert jnp.allclose(out_pad[:, :action_dim], ref2, atol=2e-3, rtol=2e-3)
    assert jnp.all(out_pad[:, action_dim:] == 0.0)

    print("KERNEL_OK")
</pallas_src>

<mosaic_0001>
module attributes {stable_mosaic.version = 11 : i64} {
  func.func @dqn_kernel(%arg0: i32, %arg1: memref<16x32xf32, #tpu.memory_space<vmem>>, %arg2: memref<32x256xbf16, #tpu.memory_space<vmem>>, %arg3: memref<1x256xf32, #tpu.memory_space<vmem>>, %arg4: memref<256x256xbf16, #tpu.memory_space<vmem>>, %arg5: memref<1x256xf32, #tpu.memory_space<vmem>>, %arg6: memref<256x128xbf16, #tpu.memory_space<vmem>>, %arg7: memref<1x128xf32, #tpu.memory_space<vmem>>, %arg8: memref<16x128xf32, #tpu.memory_space<vmem>>, %arg9: memref<16x256xbf16, #tpu.memory_space<vmem>>, %arg10: memref<16x256xbf16, #tpu.memory_space<vmem>>) attributes {dimension_semantics = [#tpu.dimension_semantics<parallel>], iteration_bounds = array<i64: 1>, scalar_prefetch = 0 : i64, scratch_operands = 2 : i64, tpu.core_type = #tpu.core_type<tc>, window_params = [{transform_indices = @transform_0, window_bounds = array<i64: 16, 32>}, {pipeline_mode = #tpu.pipeline_mode<synchronous>, transform_indices = @transform_1, window_bounds = array<i64: 32, 256>}, {pipeline_mode = #tpu.pipeline_mode<synchronous>, transform_indices = @transform_2, window_bounds = array<i64: 1, 256>}, {pipeline_mode = #tpu.pipeline_mode<synchronous>, transform_indices = @transform_3, window_bounds = array<i64: 256, 256>}, {pipeline_mode = #tpu.pipeline_mode<synchronous>, transform_indices = @transform_4, window_bounds = array<i64: 1, 256>}, {pipeline_mode = #tpu.pipeline_mode<synchronous>, transform_indices = @transform_5, window_bounds = array<i64: 256, 128>}, {pipeline_mode = #tpu.pipeline_mode<synchronous>, transform_indices = @transform_6, window_bounds = array<i64: 1, 128>}, {transform_indices = @transform_7, window_bounds = array<i64: 16, 128>}]} {
    %c0 = arith.constant 0 : index
    %c0_0 = arith.constant 0 : index
    %0 = vector.load %arg1[%c0, %c0_0] : memref<16x32xf32, #tpu.memory_space<vmem>>, vector<16x32xf32>
    %1 = arith.truncf %0 : vector<16x32xf32> to vector<16x32xbf16>
    %c0_1 = arith.constant 0 : index
    %c0_2 = arith.constant 0 : index
    %2 = vector.load %arg2[%c0_1, %c0_2] : memref<32x256xbf16, #tpu.memory_space<vmem>>, vector<32x256xbf16>
    %cst = arith.constant dense<0.000000e+00> : vector<16x256xf32>
    %3 = tpu.matmul %1, %2, %cst {dimension_numbers = #tpu.dot_dimension_numbers<[1], [0], [0], [1], [0, 0, 1, 1], [], []>} : vector<16x32xbf16>, vector<32x256xbf16>, vector<16x256xf32> -> vector<16x256xf32>
    %4 = arith.truncf %3 : vector<16x256xf32> to vector<16x256xbf16>
    %c0_3 = arith.constant 0 : index
    %c0_4 = arith.constant 0 : index
    %5 = vector.load %arg3[%c0_3, %c0_4] : memref<1x256xf32, #tpu.memory_space<vmem>>, vector<1x256xf32>
    %6 = arith.truncf %5 : vector<1x256xf32> to vector<1x256xbf16>
    %7 = vector.broadcast %6 : vector<1x256xbf16> to vector<16x256xbf16>
    %8 = arith.addf %4, %7 : vector<16x256xbf16>
    %cst_5 = arith.constant 0.000000e+00 : bf16
    %9 = vector.broadcast %cst_5 : bf16 to vector<16x256xbf16>
    %10 = arith.maximumf %8, %9 : vector<16x256xbf16>
    %c0_6 = arith.constant 0 : index
    %c0_7 = arith.constant 0 : index
    %11 = vector.load %arg9[%c0_6, %c0_7] : memref<16x256xbf16, #tpu.memory_space<vmem>>, vector<16x256xbf16>
    tpu.vector_store %arg9[%c0_6, %c0_7], %10 {strides = array<i32>} : memref<16x256xbf16, #tpu.memory_space<vmem>>, vector<16x256xbf16>,
    %c0_8 = arith.constant 0 : index
    %c0_9 = arith.constant 0 : index
    %12 = vector.load %arg9[%c0_8, %c0_9] : memref<16x256xbf16, #tpu.memory_space<vmem>>, vector<16x256xbf16>
    %c0_10 = arith.constant 0 : index
    %c0_11 = arith.constant 0 : index
    %13 = vector.load %arg4[%c0_10, %c0_11] : memref<256x256xbf16, #tpu.memory_space<vmem>>, vector<256x256xbf16>
    %cst_12 = arith.constant dense<0.000000e+00> : vector<16x256xf32>
    %14 = tpu.matmul %12, %13, %cst_12 {dimension_numbers = #tpu.dot_dimension_numbers<[1], [0], [0], [1], [0, 0, 1, 1], [], []>} : vector<16x256xbf16>, vector<256x256xbf16>, vector<16x256xf32> -> vector<16x256xf32>
    %15 = arith.truncf %14 : vector<16x256xf32> to vector<16x256xbf16>
    %c0_13 = arith.constant 0 : index
    %c0_14 = arith.constant 0 : index
    %16 = vector.load %arg5[%c0_13, %c0_14] : memref<1x256xf32, #tpu.memory_space<vmem>>, vector<1x256xf32>
    %17 = arith.truncf %16 : vector<1x256xf32> to vector<1x256xbf16>
    %18 = vector.broadcast %17 : vector<1x256xbf16> to vector<16x256xbf16>
    %19 = arith.addf %15, %18 : vector<16x256xbf16>
    %cst_15 = arith.constant 0.000000e+00 : bf16
    %20 = vector.broadcast %cst_15 : bf16 to vector<16x256xbf16>
    %21 = arith.maximumf %19, %20 : vector<16x256xbf16>
    %c0_16 = arith.constant 0 : index
    %c0_17 = arith.constant 0 : index
    %22 = vector.load %arg10[%c0_16, %c0_17] : memref<16x256xbf16, #tpu.memory_space<vmem>>, vector<16x256xbf16>
    tpu.vector_store %arg10[%c0_16, %c0_17], %21 {strides = array<i32>} : memref<16x256xbf16, #tpu.memory_space<vmem>>, vector<16x256xbf16>,
    %c0_18 = arith.constant 0 : index
    %c0_19 = arith.constant 0 : index
    %23 = vector.load %arg10[%c0_18, %c0_19] : memref<16x256xbf16, #tpu.memory_space<vmem>>, vector<16x256xbf16>
    %c0_20 = arith.constant 0 : index
    %c0_21 = arith.constant 0 : index
    %24 = vector.load %arg6[%c0_20, %c0_21] : memref<256x128xbf16, #tpu.memory_space<vmem>>, vector<256x128xbf16>
    %cst_22 = arith.constant dense<0.000000e+00> : vector<16x128xf32>
    %25 = tpu.matmul %23, %24, %cst_22 {dimension_numbers = #tpu.dot_dimension_numbers<[1], [0], [0], [1], [0, 0, 1, 1], [], []>} : vector<16x256xbf16>, vector<256x128xbf16>, vector<16x128xf32> -> vector<16x128xf32>
    %c0_23 = arith.constant 0 : index
    %c0_24 = arith.constant 0 : index
    %26 = vector.load %arg7[%c0_23, %c0_24] : memref<1x128xf32, #tpu.memory_space<vmem>>, vector<1x128xf32>
    %27 = vector.broadcast %26 : vector<1x128xf32> to vector<16x128xf32>
    %28 = arith.addf %25, %27 : vector<16x128xf32>
    %c0_25 = arith.constant 0 : index
    %c0_26 = arith.constant 0 : index
    %29 = vector.load %arg8[%c0_25, %c0_26] : memref<16x128xf32, #tpu.memory_space<vmem>>, vector<16x128xf32>
    tpu.vector_store %arg8[%c0_25, %c0_26], %28 {strides = array<i32>} : memref<16x128xf32, #tpu.memory_space<vmem>>, vector<16x128xf32>,
    return
  }
  func.func @transform_0(%arg0: i32) -> (i32, i32) {
    %c0_i32 = arith.constant 0 : i32
    %c0_i32_0 = arith.constant 0 : i32
    return %arg0, %c0_i32 : i32, i32
  }
  func.func @transform_1(%arg0: i32) -> (i32, i32) {
    %c0_i32 = arith.constant 0 : i32
    %c0_i32_0 = arith.constant 0 : i32
    %c0_i32_1 = arith.constant 0 : i32
    return %c0_i32, %c0_i32_0 : i32, i32
  }
  func.func @transform_2(%arg0: i32) -> (i32, i32) {
    %c0_i32 = arith.constant 0 : i32
    %c0_i32_0 = arith.constant 0 : i32
    %c0_i32_1 = arith.constant 0 : i32
    return %c0_i32, %c0_i32_0 : i32, i32
  }
  func.func @transform_3(%arg0: i32) -> (i32, i32) {
    %c0_i32 = arith.constant 0 : i32
    %c0_i32_0 = arith.constant 0 : i32
    %c0_i32_1 = arith.constant 0 : i32
    return %c0_i32, %c0_i32_0 : i32, i32
  }
  func.func @transform_4(%arg0: i32) -> (i32, i32) {
    %c0_i32 = arith.constant 0 : i32
    %c0_i32_0 = arith.constant 0 : i32
    %c0_i32_1 = arith.constant 0 : i32
    return %c0_i32, %c0_i32_0 : i32, i32
  }
  func.func @transform_5(%arg0: i32) -> (i32, i32) {
    %c0_i32 = arith.constant 0 : i32
    %c0_i32_0 = arith.constant 0 : i32
    %c0_i32_1 = arith.constant 0 : i32
    return %c0_i32, %c0_i32_0 : i32, i32
  }
  func.func @transform_6(%arg0: i32) -> (i32, i32) {
    %c0_i32 = arith.constant 0 : i32
    %c0_i32_0 = arith.constant 0 : i32
    %c0_i32_1 = arith.constant 0 : i32
    return %c0_i32, %c0_i32_0 : i32, i32
  }
  func.func @transform_7(%arg0: i32) -> (i32, i32) {
    %c0_i32 = arith.constant 0 : i32
    %c0_i32_0 = arith.constant 0 : i32
    return %arg0, %c0_i32 : i32, i32
  }
}

</mosaic_0001>

<bundles_post_ra>
// kernel: tpu_custom_call.1
= control target key start
LH: loop header
LB: loop body
LE: loop exit
PB: predicated region body
PF: predicated region fallthrough
CT: control target
= control target key end

     0   :  { %12 = vsyncpa [#allocation5], 0  ;;  %s1068_s0 = inlined_call_operand.hbm [shape: f32[8,32], index: 0, kind: input, shape index: {}]   ;;  %s1069_s1 = inlined_call_operand.hbm [shape: bf16[32,256], index: 1, kind: input, shape index: {}]   ;;  %s1070_s2 = inlined_call_operand.vmem [shape: f32[1,256], index: 2, kind: input, shape index: {}]   ;;  %s1071_s3 = inlined_call_operand.hbm [shape: bf16[256,256], index: 3, kind: input, shape index: {}]   ;;  %s1072_s4 = inlined_call_operand.vmem [shape: f32[1,256], index: 4, kind: input, shape index: {}]   ;;  %s1073_s5 = inlined_call_operand.hbm [shape: bf16[256,128], index: 5, kind: input, shape index: {}]   ;;  %s1074_s6 = inlined_call_operand.vmem [shape: f32[1,128], index: 6, kind: input, shape index: {}]   ;;  %s1075_s7 = inlined_call_operand.hbm [shape: f32[8,128], index: 7, kind: output, shape index: {}]  }
   0x1   :  { %13 = vsyncpa [#allocation8], 0 }
   0x2   :  { %14 = vsyncpa [#allocation11], 0 }
   0x3   :  { %15 = vsyncpa [#allocation6], 0 }
   0x4   :  { %20 = vsyncadd [#allocation5], 128  ;;  %s977_s24 = smov [#allocation7]   ;;  %s978_s26 = smov [#allocation4]  }
   0x5   :  { %s33_s25 = sshll.u32 %s977_s24, 4  ;;  %s21_s27 = sshll.u32 %s978_s26, 4  ;;  %s34_s25 = int_to_ptr.vmem [resolvable:$true] %s33_s25  ;;  %s22_s27 = int_to_ptr.vmem [resolvable:$true] %s21_s27 }
   0x6   :  { %s877_s28 = scalar_lea.vmem %s34_s25, 512  ;;  %p882_p1 = scmp.lt.s32.totalorder %s34_s25, %s34_s25 }
   0x7   :  { %p878_p0 = scmp.ne.s32.totalorder %s34_s25, %s877_s28  ;;  %p883_p2 = scmp.lt.s32.totalorder %s877_s28, %s877_s28 }
   0x9   :  { %p884_p3 = por %p883_p2, %p882_p1 }
   0xb   :  { %p885_p4 = pnand %p884_p3, %p878_p0 }
   0xd   :  { %888 = shalt.err (!%p885_p4)
}
   0xe   :  { %s979_s29 = smov 128   ;;  %s980_s30 = smov 8  }
   0xf   :  { %39 = dma.hbm_to_vmem [thread:$0]  %s1069_s1, 512, %s34_s25, [#allocation8], %s979_s29, %s979_s29, %s980_s30  }
  0x10   :  { %s897_s10 = scalar_lea.vmem %s22_s27, 128  ;;  %s901_s11 = scalar_lea.vmem %s22_s27, 256 }
  0x11   :  { %p898_p5 = scmp.ne.s32.totalorder %s22_s27, %s897_s10  ;;  %p902_p6 = scmp.lt.s32.totalorder %s22_s27, %s22_s27 }
  0x12   :  { %p903_p7 = scmp.lt.s32.totalorder %s901_s11, %s897_s10 }
  0x14   :  { %p904_p8 = por %p903_p7, %p902_p6 }
  0x16   :  { %p905_p9 = pnand %p904_p8, %p898_p5 }
  0x18   :  { %908 = shalt.err (!%p905_p9)
}
  0x19   :  { %27 = dma.hbm_to_vmem [thread:$0]  %s1068_s0, 128, %s22_s27, [#allocation5], %s979_s29, %s979_s29, %s980_s30  }
  0x1a   :  { %s981_s14 = smov [#allocation9]   ;;  %s982_s16 = smov [#allocation10]  }
  0x1b   :  { %s47_s15 = sshll.u32 %s981_s14, 4  ;;  %s61_s17 = sshll.u32 %s982_s16, 4  ;;  %s48_s15 = int_to_ptr.vmem [resolvable:$true] %s47_s15  ;;  %s62_s17 = int_to_ptr.vmem [resolvable:$true] %s61_s17 }
  0x1c   :  { %s917_s1 = scalar_lea.vmem %s48_s15, 4096  ;;  %p922_p11 = scmp.lt.s32.totalorder %s48_s15, %s48_s15 }
  0x1d   :  { %p918_p10 = scmp.ne.s32.totalorder %s48_s15, %s917_s1  ;;  %p923_p12 = scmp.lt.s32.totalorder %s917_s1, %s917_s1 }
  0x1f   :  { %p924_p13 = por %p923_p12, %p922_p11 }
  0x21   :  { %p925_p0 = pnand %p924_p13, %p918_p10 }
  0x23   :  { %928 = shalt.err (!%p925_p0)
}
  0x24   :  { %53 = dma.hbm_to_vmem [thread:$0]  %s1071_s3, 4096, %s48_s15, [#allocation8], %s979_s29, %s979_s29, %s980_s30  }
  0x25   :  { %s937_s0 = scalar_lea.vmem %s62_s17, 2048  ;;  %p942_p2 = scmp.lt.s32.totalorder %s62_s17, %s62_s17 }
  0x26   :  { %p938_p1 = scmp.ne.s32.totalorder %s62_s17, %s937_s0  ;;  %p943_p3 = scmp.lt.s32.totalorder %s937_s0, %s937_s0 }
  0x28   :  { %p944_p4 = por %p943_p3, %p942_p2 }
  0x2a   :  { %p945_p5 = pnand %p944_p4, %p938_p1 }
  0x2c   :  { %948 = shalt.err (!%p945_p5)
}
  0x2d   :  { %s983_s20 = smov 64   ;;  %s984_s21 = smov 4  }
  0x2e   :  { %67 = dma.hbm_to_vmem [thread:$0]  %s1073_s5, 2048, %s62_s17, [#allocation11], %s983_s20, %s983_s20, %s984_s21  }
  0x2f   :  { %969 = dma.done.wait [#allocation5], 256  }
  0x30   :  { %970 = vsyncadd [#allocation5], 4294967040 }
  0x31   :  { %971 = dma.done.wait [#allocation8], 4608  }
  0x32   :  { %972 = vsyncadd [#allocation8], 4294962688 }
  0x33   :  { %973 = dma.done.wait [#allocation11], 2048  }
  0x34   :  { %974 = vsyncadd [#allocation11], 4294965248  ;;  %v985_v0 = vmov 0   ;;  %v799_v1 = vld [vmem:[#allocation7 + $0x14] ss:$8 sps:$4 sm:$0xff]   ;;  %vm110_vm0 = vcmask 261120   ;;  %v161_v50 = vlaneseq }
  0x35   :  { %146 = vmatprep.mubr.bf16.mxu0 %v985_v0  ;;  %v801_v2 = vld [vmem:[#allocation7 + $0x10] ss:$8 sps:$4 sm:$0xff]   ;;  %126 = vmatprep.subr.bf16.mxu0 %v799_v1  ;;  %v802_v3 = vld [vmem:[#allocation7 + $0x4] ss:$8 sps:$4 sm:$0xff]   ;;  %v804_v4 = vld [vmem:[#allocation7] ss:$8 sps:$4 sm:$0xff]  }
  0x36   :  { %v83_v5 = vld [vmem:[#allocation4] sm:$0xff]  ;;  %127 = vmatpush1.bf16.msra.mxu0 %v801_v2  ;;  %v84_v6 = vld [vmem:[#allocation4 + $0x8] sm:$0xff]  ;;  %v808_v9 = vld [vmem:[#allocation9 + $0x64] ss:$8 sps:$4 sm:$0xff]   ;;  %v162_v51 = vshrl.u32 %v161_v50, 7 }
  0x37   :  { %128 = vmatprep.subr.bf16.mxu0 %v802_v3  ;;  %v805_v7 = vld [vmem:[#allocation9 + $0x74] ss:$8 sps:$4 sm:$0xff]   ;;  %v807_v8 = vld [vmem:[#allocation9 + $0x70] ss:$8 sps:$4 sm:$0xff]   ;;  %v85_v10 = vpack.c.bf16 %v84_v6, %v83_v5  ;;  %v810_v11 = vld [vmem:[#allocation9 + $0x60] ss:$8 sps:$4 sm:$0xff]  }
  0x38   :  { %407 = vmatprep.subr.bf16.mxu1 %v805_v7  ;;  %v811_v12 = vld [vmem:[#allocation9 + $0x54] ss:$8 sps:$4 sm:$0xff]   ;;  %v813_v13 = vld [vmem:[#allocation9 + $0x50] ss:$8 sps:$4 sm:$0xff]   ;;  %v814_v14 = vld [vmem:[#allocation9 + $0x44] ss:$8 sps:$4 sm:$0xff]  }
  0x39   :  { %408 = vmatpush1.bf16.msra.mxu1 %v807_v8  ;;  %v816_v15 = vld [vmem:[#allocation9 + $0x40] ss:$8 sps:$4 sm:$0xff]   ;;  %v817_v16 = vld [vmem:[#allocation9 + $0x34] ss:$8 sps:$4 sm:$0xff]   ;;  %v819_v17 = vld [vmem:[#allocation9 + $0x30] ss:$8 sps:$4 sm:$0xff]  }
  0x3a   :  { %129 = vmatpush1.bf16.msra.mxu0 %v804_v4  ;;  %409 = vmatprep.subr.bf16.mxu1 %v808_v9  ;;  %v820_v18 = vld [vmem:[#allocation9 + $0x24] ss:$8 sps:$4 sm:$0xff]   ;;  %v822_v19 = vld [vmem:[#allocation9 + $0x20] ss:$8 sps:$4 sm:$0xff]   ;;  %v823_v20 = vld [vmem:[#allocation9 + $0x14] ss:$8 sps:$4 sm:$0xff]  }
  0x3b   :  { %v825_v21 = vld [vmem:[#allocation9 + $0x10] ss:$8 sps:$4 sm:$0xff]   ;;  %v826_v22 = vld [vmem:[#allocation9 + $0x4] ss:$8 sps:$4 sm:$0xff]   ;;  %v828_v23 = vld [vmem:[#allocation9] ss:$8 sps:$4 sm:$0xff]  }
  0x3c   :  { %v829_v24 = vld [vmem:[#allocation9 + $0xf4] ss:$8 sps:$4 sm:$0xff]   ;;  %v831_v25 = vld [vmem:[#allocation9 + $0xf0] ss:$8 sps:$4 sm:$0xff]   ;;  %v832_v26 = vld [vmem:[#allocation9 + $0xe4] ss:$8 sps:$4 sm:$0xff]  }
  0x3d   :  { %709 = vmatmul.mubr.msk.bf16.vlgmr.msra.gmra.mxu0 %vm110_vm0, %v85_v10  ;;  %410 = vmatpush1.bf16.msra.mxu1 %v810_v11  ;;  %v834_v27 = vld [vmem:[#allocation9 + $0xe0] ss:$8 sps:$4 sm:$0xff]   ;;  %v835_v28 = vld [vmem:[#allocation9 + $0xd4] ss:$8 sps:$4 sm:$0xff]   ;;  %v837_v29 = vld [vmem:[#allocation9 + $0xd0] ss:$8 sps:$4 sm:$0xff]  }
  0x3e   :  { %411 = vmatprep.subr.bf16.mxu1 %v811_v12  ;;  %v838_v30 = vld [vmem:[#allocation9 + $0xc4] ss:$8 sps:$4 sm:$0xff]   ;;  %v840_v31 = vld [vmem:[#allocation9 + $0xc0] ss:$8 sps:$4 sm:$0xff]   ;;  %v841_v32 = vld [vmem:[#allocation9 + $0xb4] ss:$8 sps:$4 sm:$0xff]  }
  0x3f   :  { %v843_v33 = vld [vmem:[#allocation9 + $0xb0] ss:$8 sps:$4 sm:$0xff]   ;;  %v844_v34 = vld [vmem:[#allocation9 + $0xa4] ss:$8 sps:$4 sm:$0xff]   ;;  %v846_v35 = vld [vmem:[#allocation9 + $0xa0] ss:$8 sps:$4 sm:$0xff]  }
  0x40   :  { %v847_v36 = vld [vmem:[#allocation9 + $0x94] ss:$8 sps:$4 sm:$0xff]   ;;  %v849_v37 = vld [vmem:[#allocation9 + $0x90] ss:$8 sps:$4 sm:$0xff]   ;;  %v850_v38 = vld [vmem:[#allocation9 + $0x84] ss:$8 sps:$4 sm:$0xff]  }
  0x41   :  { %412 = vmatpush1.bf16.msra.mxu1 %v813_v13  ;;  %v852_v39 = vld [vmem:[#allocation9 + $0x80] ss:$8 sps:$4 sm:$0xff]   ;;  %v853_v40 = vld [vmem:[#allocation10 + $0x78] sm:$0xff]   ;;  %v855_v42 = vld [vmem:[#allocation10 + $0x70] sm:$0xff]   ;;  %v163_v52 = vsub.s32 0, %v162_v51  ;;  %v167_v54 = vsub.s32 1, %v162_v51 }
  0x42   :  { %413 = vmatprep.subr.bf16.mxu1 %v814_v14  ;;  %v854_v41 = vld [vmem:[#allocation10 + $0x38] sm:$0xff]   ;;  %767 = vmatprep.subr.bf16.mxu0 %v853_v40  ;;  %v856_v43 = vld [vmem:[#allocation10 + $0x30] sm:$0xff]   ;;  %v857_v44 = vld [vmem:[#allocation10 + $0x68] sm:$0xff]  }
  0x43   :  { %768 = vmatpush3.bf16.msra.mxu0 %v854_v41  ;;  %v858_v45 = vld [vmem:[#allocation10 + $0x28] sm:$0xff]   ;;  %v859_v46 = vld [vmem:[#allocation10 + $0x60] sm:$0xff]   ;;  %v861_v48 = vld [vmem:[#allocation10 + $0x58] sm:$0xff]  }
  0x44   :  { %769 = vmatprep.subr.bf16.mxu0 %v855_v42  ;;  %v860_v47 = vld [vmem:[#allocation10 + $0x20] sm:$0xff]   ;;  %v862_v49 = vld [vmem:[#allocation10 + $0x18] sm:$0xff]   ;;  %v159_v53 = vld [vmem:[%s1070_s2] sm:$0x3] }
  0x45   :  { %414 = vmatpush1.bf16.msra.mxu1 %v816_v15  ;;  %v164_v55 = vrot.slane %v159_v53, %v163_v52  ;;  %v168_v56 = vrot.slane %v159_v53, %v167_v54  ;;  %v863_v10 = vld [vmem:[#allocation10 + $0x50] sm:$0xff]   ;;  %v865_v12 = vld [vmem:[#allocation10 + $0x48] sm:$0xff]   ;;  %v867_v14 = vld [vmem:[#allocation10 + $0x40] sm:$0xff]  }
  0x46   :  { %415 = vmatprep.subr.bf16.mxu1 %v817_v16  ;;  %v864_v11 = vld [vmem:[#allocation10 + $0x10] sm:$0xff]   ;;  %v866_v13 = vld [vmem:[#allocation10 + $0x8] sm:$0xff]   ;;  %v868_v15 = vld [vmem:[#allocation10] sm:$0xff]  }
  0x47   :  { %770 = vmatpush3.bf16.msra.mxu0 %v856_v43  ;;  %v171_v57 = vpack.c.bf16 %v164_v55, %v164_v55  ;;  %v172_v58 = vpack.c.bf16 %v168_v56, %v168_v56  ;;  %v452_v16 = vld [vmem:[%s1072_s4] sm:$0x3] }
  0x48   :  { %771 = vmatprep.subr.bf16.mxu0 %v857_v44 }
  0x49   :  { %416 = vmatpush1.bf16.msra.mxu1 %v819_v17  ;;  %v174_v60 = vpack.i.b16 %v171_v57, %v171_v57  ;;  %v181_v61 = vpack.i.b16 %v172_v58, %v172_v58  ;;  %v457_v17 = vrot.slane %v452_v16, %v163_v52 }
  0x4a   :  { %417 = vmatprep.subr.bf16.mxu1 %v820_v18  ;;  %v461_v18 = vrot.slane %v452_v16, %v167_v54 }
  0x4b   :  { %772 = vmatpush3.bf16.msra.mxu0 %v858_v45  ;;  %v179_v1 = vrot.slane %v174_v60, %v163_v52  ;;  %v186_v3 = vrot.slane %v181_v61, %v163_v52 }
  0x4c   :  { %773 = vmatprep.subr.bf16.mxu0 %v859_v46 }
  0x4d   :  { %418 = vmatpush1.bf16.msra.mxu1 %v822_v19  ;;  %v464_v19 = vpack.c.bf16 %v457_v17, %v457_v17 }
  0x4e   :  { %419 = vmatprep.subr.bf16.mxu1 %v823_v20  ;;  %v465_v20 = vpack.c.bf16 %v461_v18, %v461_v18 }
  0x4f   :  { %774 = vmatpush3.bf16.msra.mxu0 %v860_v47 }
  0x50   :  { %775 = vmatprep.subr.bf16.mxu0 %v861_v48 }
  0x51   :  { %420 = vmatpush1.bf16.msra.mxu1 %v825_v21 }
  0x52   :  { %421 = vmatprep.subr.bf16.mxu1 %v826_v22  ;;  %v467_v22 = vpack.i.b16 %v464_v19, %v464_v19 }
  0x53   :  { %776 = vmatpush3.bf16.msra.mxu0 %v862_v49 }
  0x54   :  { %777 = vmatprep.subr.bf16.mxu0 %v863_v10 }
  0x55   :  { %422 = vmatpush1.bf16.msra.mxu1 %v828_v23  ;;  %v474_v23 = vpack.i.b16 %v465_v20, %v465_v20 }
  0x56   :  { %423 = vmatprep.subr.bf16.mxu1 %v829_v24 }
  0x57   :  { %778 = vmatpush3.bf16.msra.mxu0 %v864_v11 }
  0x58   :  { %779 = vmatprep.subr.bf16.mxu0 %v865_v12 }
  0x59   :  { %424 = vmatpush2.bf16.msra.mxu1 %v831_v25 }
  0x5a   :  { %425 = vmatprep.subr.bf16.mxu1 %v832_v26  ;;  %v472_v26 = vrot.slane %v467_v22, %v163_v52 }
  0x5b   :  { %780 = vmatpush3.bf16.msra.mxu0 %v866_v13 }
  0x5c   :  { %781 = vmatprep.subr.bf16.mxu0 %v867_v14 }
  0x5d   :  { %426 = vmatpush2.bf16.msra.mxu1 %v834_v27 }
  0x5e   :  { %427 = vmatprep.subr.bf16.mxu1 %v835_v28  ;;  %v479_v28 = vrot.slane %v474_v23, %v163_v52 }
  0x5f   :  { %782 = vmatpush3.bf16.msra.mxu0 %v868_v15 }
  0x61   :  { %428 = vmatpush2.bf16.msra.mxu1 %v837_v29 }
  0x62   :  { %429 = vmatprep.subr.bf16.mxu1 %v838_v30 }
  0x65   :  { %430 = vmatpush2.bf16.msra.mxu1 %v840_v31 }
  0x66   :  { %431 = vmatprep.subr.bf16.mxu1 %v841_v32 }
  0x69   :  { %432 = vmatpush2.bf16.msra.mxu1 %v843_v33 }
  0x6a   :  { %433 = vmatprep.subr.bf16.mxu1 %v844_v34 }
  0x6d   :  { %434 = vmatpush2.bf16.msra.mxu1 %v846_v35 }
  0x6e   :  { %435 = vmatprep.subr.bf16.mxu1 %v847_v36  ;;  %v748_v36 = vld [vmem:[%s1074_s6] ss:$0 sm:$0xff] }
  0x71   :  { %436 = vmatpush2.bf16.msra.mxu1 %v849_v37 }
  0x72   :  { %437 = vmatprep.subr.bf16.mxu1 %v850_v38 }
  0x75   :  { %438 = vmatpush2.bf16.msra.mxu1 %v852_v39 }
  0xfd   :  { %v148_v59 = vpop.f32.mrf.mxu0 }
  0xff   :  { %v150_v62 = vpop.f32.mrf.mxu0 }
 0x101   :  { %v152_v63 = vpop.f32.mrf.mxu0 }
 0x102   :  { %v157_v2 = vpack.c.bf16 %v152_v63, %v148_v59 }
 0x103   :  { %v154_v4 = vpop.f32.mrf.mxu0 }
 0x104   :  { %v158_v5 = vpack.c.bf16 %v154_v4, %v150_v62  ;;  %v187_v6 = vadd.bf16 %v179_v1, %v157_v2 }
 0x106   :  { %v188_v7 = vadd.bf16 %v186_v3, %v158_v5  ;;  %v189_v9 = vmax.bf16 %v985_v0, %v187_v6 }
 0x108   :  { %v190_v8 = vmax.bf16 %v985_v0, %v188_v7 }
 0x10a   :  { %439 = vmatprep.mubr.bf16.mxu1 %v190_v8 }
 0x10b   :  { %440 = vmatmul.mubr.bf16.vlgmr.msra.gmra.mxu1 %v189_v9 }
 0x1cb   :  { %v441_v21 = vpop.f32.mrf.mxu1 }
 0x1cd   :  { %v443_v24 = vpop.f32.mrf.mxu1 }
 0x1cf   :  { %v445_v25 = vpop.f32.mrf.mxu1 }
 0x1d0   :  { %v450_v27 = vpack.c.bf16 %v445_v25, %v441_v21 }
 0x1d1   :  { %v447_v29 = vpop.f32.mrf.mxu1 }
 0x1d2   :  { %v451_v30 = vpack.c.bf16 %v447_v29, %v443_v24  ;;  %v480_v31 = vadd.bf16 %v472_v26, %v450_v27 }
 0x1d4   :  { %v481_v32 = vadd.bf16 %v479_v28, %v451_v30  ;;  %v482_v34 = vmax.bf16 %v985_v0, %v480_v31 }
 0x1d6   :  { %v483_v33 = vmax.bf16 %v985_v0, %v481_v32 }
 0x1d8   :  { %675 = vmatprep.mubr.bf16.mxu0 %v483_v33 }
 0x1d9   :  { %676 = vmatmul.mubr.bf16.vlgmr.msra.gmra.mxu0 %v482_v34 }
 0x299   :  { %v783_v35 = vpop.f32.mrf.mxu0 }
 0x29b   :  { %v784_v37 = vpop.f32.mrf.mxu0 }
 0x29c   :  { %v785_v38 = vadd.f32 %v784_v37, %v783_v35 }
 0x29d   :  { %v786_v39 = vpop.f32.mrf.mxu0 }
 0x29e   :  { %v678_v40 = vadd.f32 %v785_v38, %v748_v36 }
 0x29f   :  { %v787_v41 = vpop.f32.mrf.mxu0 }
 0x2a0   :  { %684 = vst [vmem:[#allocation12] sm:$0xff] %v678_v40  ;;  %v788_v42 = vadd.f32 %v787_v41, %v786_v39 }
 0x2a2   :  { %v681_v43 = vadd.f32 %v788_v42, %v748_v36 }
 0x2a4   :  { %685 = vst [vmem:[#allocation12 + $0x8] sm:$0xff] %v681_v43 }
 0x2a5   :  { %690 = vsyncadd [#allocation6], 128  ;;  %s986_s26 = smov [#allocation12]  }
 0x2a6   :  { %s691_s27 = sshll.u32 %s986_s26, 4  ;;  %s692_s27 = int_to_ptr.vmem [resolvable:$true] %s691_s27 }
 0x2a7   :  { %s949_s28 = scalar_lea.vmem %s692_s27, 128  ;;  %s953_s8 = scalar_lea.vmem %s692_s27, 256 }
 0x2a8   :  { %p950_p6 = scmp.ne.s32.totalorder %s692_s27, %s949_s28  ;;  %p954_p7 = scmp.lt.s32.totalorder %s692_s27, %s692_s27 }
 0x2a9   :  { %p955_p8 = scmp.lt.s32.totalorder %s953_s8, %s949_s28 }
 0x2ab   :  { %p956_p9 = por %p955_p8, %p954_p7 }
 0x2ad   :  { %p957_p10 = pnand %p956_p9, %p950_p6 }
 0x2af   :  { %960 = shalt.err (!%p957_p10)
}
 0x2b0   :  { %697 = dma.vmem_to_hbm [thread:$0]  %s692_s27, 128, %s1075_s7, [#allocation6], %s979_s29, %s979_s29, %s980_s30  }
 0x2b1   :  { %975 = dma.done.wait [#allocation6], 256  }
 0x2b2   :  { %976 = vsyncadd [#allocation6], 4294967040 }
 0x2b3   :  { %701 = vsyncpa [#allocation5], 1 }
 0x2b4   :  { %702 = vsyncpa [#allocation8], 1 }
 0x2b5   :  { %703 = vsyncpa [#allocation11], 1 }
 0x2b6   :  { %704 = vsyncpa [#allocation6], 1 }

</bundles_post_ra>
